<compile_context>
chip_gen: v7x
topology: tpu7x:2x2x1
jax: 0.10.0
libtpu: 0.0.40
codegen_flags: <defaults>
</compile_context>

<pallas_src>
import numpy as np
import jax
import jax.numpy as jnp
from jax.experimental import pallas as pl
from jax.experimental.pallas import tpu as pltpu

# ----------------------------- configuration -------------------------------
DIM = 32          # text hidden dim
DIM_VISUAL = 16   # visual (perceiver latent) dim
DIM_HEAD = 8
HEADS = 2
FF_MULT = 4
INNER = DIM_HEAD * HEADS        # 16
FF_INNER = DIM * FF_MULT        # 128
LN_EPS = 1e-5
SCALE = DIM_HEAD ** (-0.5)
NEG_BIG = float(jnp.finfo(jnp.float32).min)   # == -finfo(float32).max

# packed small-parameter slab layout (rows, 128 lanes), all 8-row aligned
SLAB_LANES = 128
SLAB_LN_ROW = 0     # rows 0..3 : ln1_g, ln1_b, ln2_g, ln2_b   (cols 0:DIM)
SLAB_WQ_ROW = 8     # rows 8..39 : Wq   (DIM x INNER)
SLAB_WKV_ROW = 40   # rows 40..55: Wkv  (DIM_VISUAL x 2*INNER)
SLAB_WOUT_ROW = 56  # rows 56..71: Wout (INNER x DIM)
SLAB_ROWS = 72


# ----------------------- host-side mask preprocessing ----------------------
def chunk2mask_np(input_tensor: np.ndarray):
    """Exact numpy replication of the PyTorch chunk2mask()."""
    INT_MAX = 10000
    inp = np.array(input_tensor, dtype=np.int64)
    out = inp.copy()
    for r in range(out.shape[0]):
        nz = np.flatnonzero(inp[r])
        if len(nz) == 0:
            continue
        vals = inp[r, nz]
        for i in range(1, len(nz)):
            out[r, nz[i - 1] + 1:nz[i] + 1] = vals[i]
    for r in range(out.shape[0]):
        nz = np.flatnonzero(out[r])
        if len(nz) > 0:
            out[r, nz[-1] + 1:] = INT_MAX
    for r in range(out.shape[0]):
        row = out[r]
        nz = np.flatnonzero(row)
        if len(nz) > 0:
            fi = int(nz[0])
            fv = row[fi]
            for j in range(fi, 0, -1):
                if row[j] == 0:
                    row[j] = fv
    rev = out.copy()
    for r in range(rev.shape[0]):
        row = rev[r]
        uniq = np.unique(row)
        for val in uniq:
            if val == 0:
                continue
            row[np.where(row == val)] = uniq[uniq < val].max()
    rev[:, 0] = INT_MAX
    return out, rev


def build_text_to_media_mask(media_locations, chunk_locations, t_img, n_lat):
    """(B, T_txt, T_img*n_lat) int32 mask, 1 == attendable (use_cached_media=False path)."""
    text_time = np.cumsum(media_locations.astype(np.int64), axis=-1)
    chunk_tensor = chunk_locations.astype(np.int64) * text_time
    chunk_mask, inverse_mask = chunk2mask_np(chunk_tensor)
    media_time = np.arange(t_img, dtype=np.int64) + 1
    m_ge = chunk_mask[:, :, None] >= media_time[None, None, :]
    m_lt = inverse_mask[:, :, None] < media_time[None, None, :]
    mask = np.logical_and(m_ge, m_lt)                  # (B, T_txt, T_img)
    mask = np.repeat(mask, n_lat, axis=-1)             # 'b i j -> b i (j n)'
    return mask.astype(np.int32)


# ------------------------------- the kernel ---------------------------------
def _layernorm(v, g, b):
    mu = jnp.mean(v, axis=-1, keepdims=True)
    var = jnp.mean(jnp.square(v - mu), axis=-1, keepdims=True)
    return (v - mu) * jax.lax.rsqrt(var + LN_EPS) * g + b


def _gelu_tanh(v):
    # tanh-approximation GELU: single EUP tanh instead of an erf polynomial on
    # the VPU.  |err| vs exact-erf GELU < 1e-3 absolute (here inputs are ~0.1,
    # so the difference is far below the 1e-2 test tolerance).
    c = 0.7978845608028654  # sqrt(2/pi)
    return 0.5 * v * (1.0 + jnp.tanh(c * (v + 0.044715 * v * v * v)))


def gca_kernel(x_ref, media_ref, bias_ref, slab_ref, wff1_ref, wff2_ref,
               gates_ref, out_ref):
    Bb, T, D = x_ref.shape            # batch-block, text tokens, hidden
    S = media_ref.shape[1]            # flattened media tokens

    # flatten batch-block into the sublane dim for all batch-independent math
    x = x_ref[...].reshape(Bb * T, D)                       # (Bb*T, D)
    media = media_ref[...].reshape(Bb * S, DIM_VISUAL)      # (Bb*S, Dv)
    bias = bias_ref[...]                                    # (Bb, T, S) additive

    # unpack the small-parameter slab (static leading-axis slices)
    ln1_g = slab_ref[SLAB_LN_ROW + 0:SLAB_LN_ROW + 1, :D]
    ln1_b = slab_ref[SLAB_LN_ROW + 1:SLAB_LN_ROW + 2, :D]
    ln2_g = slab_ref[SLAB_LN_ROW + 2:SLAB_LN_ROW + 3, :D]
    ln2_b = slab_ref[SLAB_LN_ROW + 3:SLAB_LN_ROW + 4, :D]
    wq = slab_ref[SLAB_WQ_ROW:SLAB_WQ_ROW + D, :INNER]
    wkv = slab_ref[SLAB_WKV_ROW:SLAB_WKV_ROW + DIM_VISUAL, :2 * INNER]
    wout = slab_ref[SLAB_WOUT_ROW:SLAB_WOUT_ROW + INNER, :D]

    # ---------------- masked multi-head cross attention ----------------
    xn = _layernorm(x, ln1_g, ln1_b)
    q = jnp.dot(xn, wq, preferred_element_type=jnp.float32) * SCALE    # (Bb*T, INNER)
    kv = jnp.dot(media, wkv, preferred_element_type=jnp.float32)       # (Bb*S, 2*INNER)

    head_outs = []
    for b in range(Bb):                       # static unroll (Bb is 1 or 2)
        bias_b = bias[b]                      # (T, S)
        per_head = []
        for h in range(HEADS):                # static unroll over heads
            lo = h * DIM_HEAD
            qh = q[b * T:(b + 1) * T, lo:lo + DIM_HEAD]
            kh = kv[b * S:(b + 1) * S, lo:lo + DIM_HEAD]
            vh = kv[b * S:(b + 1) * S, INNER + lo:INNER + lo + DIM_HEAD]
            sim = jax.lax.dot_general(qh, kh, (((1,), (1,)), ((), ())),
                                      preferred_element_type=jnp.float32)
            sim = sim + bias_b                # hoisted additive mask bias
            sim = sim - jnp.max(sim, axis=-1, keepdims=True)
            p = jnp.exp(sim)
            attn = p * pl.reciprocal(jnp.sum(p, axis=-1, keepdims=True),
                                     approx=True)
            per_head.append(jnp.dot(attn, vh, preferred_element_type=jnp.float32))
        head_outs.append(jnp.concatenate(per_head, axis=-1))            # (T, INNER)
    o_all = head_outs[0] if Bb == 1 else jnp.concatenate(head_outs, axis=0)
    # single output projection for all batch rows / heads
    attn_out = jnp.dot(o_all, wout, preferred_element_type=jnp.float32)  # (Bb*T, D)

    g_attn = gates_ref[0]   # tanh(attn_gate), precomputed in wrapper
    g_ff = gates_ref[1]     # tanh(ff_gate)
    y = attn_out * g_attn + x

    # ---------------------- gated feed-forward ---------------------
    yn = _layernorm(y, ln2_g, ln2_b)
    h1 = jnp.dot(yn, wff1_ref[...], preferred_element_type=jnp.float32)
    h1 = _gelu_tanh(h1)
    ff = jnp.dot(h1, wff2_ref[...], preferred_element_type=jnp.float32)

    # one contiguous full-block store per grid step
    out_ref[...] = (ff * g_ff + y).reshape(out_ref.shape)


# ------------------------------- wrapper ------------------------------------
def _dual_tensorcore_chip() -> bool:
    """True on chips with 2 TensorCores sharing the grid (v7x, v4 megacore)."""
    try:
        kind = jax.devices()[0].device_kind.lower()
    except Exception:
        return False
    return ("v7" in kind) or ("7x" in kind) or ("v4" in kind)


def _pack_param_slab(params):
    """Pack LN params + Wq + Wkv + Wout into one (72, 128) f32 slab."""
    def pad(a, rows):
        a = a.astype(jnp.float32)
        r, c = a.shape
        return jnp.pad(a, ((0, rows - r), (0, SLAB_LANES - c)))
    ln = jnp.concatenate([params["ln1_g"], params["ln1_b"],
                          params["ln2_g"], params["ln2_b"]], axis=0)   # (4, D)
    return jnp.concatenate([pad(ln, 8),
                            pad(params["wq"], DIM),
                            pad(params["wkv"], DIM_VISUAL),
                            pad(params["wout"], INNER)], axis=0)       # (72, 128)


def gated_cross_attention_block(x, media, media_locations, chunk_locations, params):
    B, T_txt, D = x.shape
    _, T_img, n_lat, Dv = media.shape
    S_img = T_img * n_lat

    media_flat = media.reshape(B, S_img, Dv)

    # host-side: boolean mask -> additive float bias (0 attendable, -max blocked)
    mask = build_text_to_media_mask(np.asarray(media_locations),
                                    np.asarray(chunk_locations), T_img, n_lat)
    bias = jnp.asarray(np.where(mask != 0, np.float32(0.0),
                                np.float32(NEG_BIG)).astype(np.float32))

    gates = jnp.tanh(jnp.concatenate([params["attn_gate"],
                                      params["ff_gate"]]).astype(jnp.float32))  # (2,)
    slab = _pack_param_slab(params)

    # single grid step on single-TC chips; one batch element per step on
    # dual-TC chips so both cores get work.
    steps = B if _dual_tensorcore_chip() else 1
    Bb = B // steps

    grid_spec = pltpu.PrefetchScalarGridSpec(
        num_scalar_prefetch=0,
        grid=(steps,),
        in_specs=[
            pl.BlockSpec((Bb, T_txt, D), lambda i: (i, 0, 0)),        # x
            pl.BlockSpec((Bb, S_img, Dv), lambda i: (i, 0, 0)),       # media (flattened)
            pl.BlockSpec((Bb, T_txt, S_img), lambda i: (i, 0, 0)),    # additive mask bias
            pl.BlockSpec((SLAB_ROWS, SLAB_LANES), lambda i: (0, 0)),  # packed small params
            pl.BlockSpec((D, FF_INNER), lambda i: (0, 0)),            # Wff1
            pl.BlockSpec((FF_INNER, D), lambda i: (0, 0)),            # Wff2
            pl.BlockSpec(memory_space=pltpu.MemorySpace.SMEM),        # tanh(gates)
        ],
        out_specs=pl.BlockSpec((Bb, T_txt, D), lambda i: (i, 0, 0)),
    )

    return pl.pallas_call(
        gca_kernel,
        out_shape=jax.ShapeDtypeStruct((B, T_txt, D), jnp.float32),
        grid_spec=grid_spec,
        compiler_params=pltpu.CompilerParams(dimension_semantics=("parallel",)),
    )(x, media_flat, bias, slab, params["wff1"], params["wff2"], gates)


# --------------------------- pure-JAX reference -----------------------------
def reference_forward(x, media, media_locations, chunk_locations, params):
    B, T, D = x.shape
    _, T_img, n_lat, Dv = media.shape
    mask = jnp.asarray(build_text_to_media_mask(np.asarray(media_locations),
                                                np.asarray(chunk_locations),
                                                T_img, n_lat)).astype(bool)

    def ln(v, g, b):
        mu = jnp.mean(v, -1, keepdims=True)
        var = jnp.mean((v - mu) ** 2, -1, keepdims=True)
        return (v - mu) / jnp.sqrt(var + LN_EPS) * g + b

    xn = ln(x, params["ln1_g"][0], params["ln1_b"][0])
    q = xn @ params["wq"]
    m = media.reshape(B, T_img * n_lat, Dv)
    kv = m @ params["wkv"]
    k, v = kv[..., :INNER], kv[..., INNER:]

    def split_heads(t):
        bb, ss, _ = t.shape
        return t.reshape(bb, ss, HEADS, DIM_HEAD).transpose(0, 2, 1, 3)

    qh, kh, vh = split_heads(q) * SCALE, split_heads(k), split_heads(v)
    sim = jnp.einsum("bhid,bhjd->bhij", qh, kh)
    sim = jnp.where(mask[:, None, :, :], sim, jnp.float32(NEG_BIG))
    sim = sim - jnp.max(sim, -1, keepdims=True)
    attn = jax.nn.softmax(sim, -1)
    out = jnp.einsum("bhij,bhjd->bhid", attn, vh)
    out = out.transpose(0, 2, 1, 3).reshape(B, T, INNER)
    attn_out = out @ params["wout"]
    y = attn_out * jnp.tanh(params["attn_gate"][0]) + x
    yn = ln(y, params["ln2_g"][0], params["ln2_b"][0])
    h1 = yn @ params["wff1"]
    h1 = 0.5 * h1 * (1.0 + jax.lax.erf(h1 / jnp.sqrt(jnp.float32(2.0))))
    ff = h1 @ params["wff2"]
    return ff * jnp.tanh(params["ff_gate"][0]) + y


# --------------------------------- main --------------------------------------
if __name__ == "__main__":
    B, T_TXT, T_IMG, N_LAT = 2, 8, 2, 4

    key = jax.random.PRNGKey(0)
    k_x, k_m, k0, k1, k2, k3, k4 = jax.random.split(key, 7)
    winit = lambda k, shape: (0.02 * jax.random.normal(k, shape, jnp.float32))

    params = {
        "ln1_g": jnp.ones((1, DIM), jnp.float32),
        "ln1_b": jnp.zeros((1, DIM), jnp.float32),
        "wq": winit(k0, (DIM, INNER)),
        "wkv": winit(k1, (DIM_VISUAL, 2 * INNER)),
        "wout": winit(k2, (INNER, DIM)),
        "ln2_g": jnp.ones((1, DIM), jnp.float32),
        "ln2_b": jnp.zeros((1, DIM), jnp.float32),
        "wff1": winit(k3, (DIM, FF_INNER)),
        "wff2": winit(k4, (FF_INNER, DIM)),
        # Module __init__ sets gates to 0.0 (tanh(0)=0); use nonzero values so
        # the attention / FF paths actually contribute to the output.
        "attn_gate": jnp.array([0.5], jnp.float32),
        "ff_gate": jnp.array([0.25], jnp.float32),
    }

    x = jax.random.normal(k_x, (B, T_TXT, DIM), jnp.float32)
    media = jax.random.normal(k_m, (B, T_IMG, N_LAT, DIM_VISUAL), jnp.float32)
    media_locations = np.array([[0, 1, 0, 0, 1, 0, 0, 0],
                                [0, 0, 1, 0, 0, 0, 1, 0]], dtype=np.int32)
    chunk_locations = np.array([[0, 0, 0, 1, 0, 0, 0, 1],
                                [0, 0, 0, 0, 1, 0, 0, 1]], dtype=np.int32)

    out = gated_cross_attention_block(x, media, media_locations, chunk_locations, params)
    out = jax.block_until_ready(out)

    ref = jax.block_until_ready(
        reference_forward(x, media, media_locations, chunk_locations, params))

    np.testing.assert_allclose(np.asarray(out), np.asarray(ref), rtol=1e-2, atol=1e-2)
    assert np.isfinite(np.asarray(out)).all()
    print("KERNEL_OK")
</pallas_src>

<mosaic_0001>
module attributes {stable_mosaic.version = 11 : i64} {
  func.func @gca_kernel(%arg0: i32, %arg1: memref<2x8x32xf32, #tpu.memory_space<vmem>>, %arg2: memref<2x8x16xf32, #tpu.memory_space<vmem>>, %arg3: memref<2x8x8xf32, #tpu.memory_space<vmem>>, %arg4: memref<72x128xf32, #tpu.memory_space<vmem>>, %arg5: memref<32x128xf32, #tpu.memory_space<vmem>>, %arg6: memref<128x32xf32, #tpu.memory_space<vmem>>, %arg7: memref<2xf32, #tpu.memory_space<smem>>, %arg8: memref<2x8x32xf32, #tpu.memory_space<vmem>>) attributes {dimension_semantics = [#tpu.dimension_semantics<parallel>], iteration_bounds = array<i64: 1>, scalar_prefetch = 0 : i64, scratch_operands = 0 : i64, tpu.core_type = #tpu.core_type<tc>, window_params = [{transform_indices = @transform_0, window_bounds = array<i64: 2, 8, 32>}, {transform_indices = @transform_1, window_bounds = array<i64: 2, 8, 16>}, {transform_indices = @transform_2, window_bounds = array<i64: 2, 8, 8>}, {pipeline_mode = #tpu.pipeline_mode<synchronous>, transform_indices = @transform_3, window_bounds = array<i64: 72, 128>}, {pipeline_mode = #tpu.pipeline_mode<synchronous>, transform_indices = @transform_4, window_bounds = array<i64: 32, 128>}, {pipeline_mode = #tpu.pipeline_mode<synchronous>, transform_indices = @transform_5, window_bounds = array<i64: 128, 32>}, {transform_indices = @transform_6, window_bounds = array<i64: 2>}, {transform_indices = @transform_7, window_bounds = array<i64: 2, 8, 32>}]} {
    %c0 = arith.constant 0 : index
    %c0_0 = arith.constant 0 : index
    %c0_1 = arith.constant 0 : index
    %0 = vector.load %arg1[%c0, %c0_0, %c0_1] : memref<2x8x32xf32, #tpu.memory_space<vmem>>, vector<2x8x32xf32>
    %1 = vector.shape_cast %0 : vector<2x8x32xf32> to vector<16x32xf32>
    %c0_2 = arith.constant 0 : index
    %c0_3 = arith.constant 0 : index
    %c0_4 = arith.constant 0 : index
    %2 = vector.load %arg2[%c0_2, %c0_3, %c0_4] : memref<2x8x16xf32, #tpu.memory_space<vmem>>, vector<2x8x16xf32>
    %3 = vector.shape_cast %2 : vector<2x8x16xf32> to vector<16x16xf32>
    %c0_5 = arith.constant 0 : index
    %c0_6 = arith.constant 0 : index
    %c0_7 = arith.constant 0 : index
    %4 = vector.load %arg3[%c0_5, %c0_6, %c0_7] : memref<2x8x8xf32, #tpu.memory_space<vmem>>, vector<2x8x8xf32>
    %c0_8 = arith.constant 0 : index
    %c0_9 = arith.constant 0 : index
    %5 = vector.load %arg4[%c0_8, %c0_9] : memref<72x128xf32, #tpu.memory_space<vmem>>, vector<1x32xf32>
    %c1 = arith.constant 1 : index
    %c0_10 = arith.constant 0 : index
    %6 = vector.load %arg4[%c1, %c0_10] : memref<72x128xf32, #tpu.memory_space<vmem>>, vector<1x32xf32>
    %c2 = arith.constant 2 : index
    %c0_11 = arith.constant 0 : index
    %7 = vector.load %arg4[%c2, %c0_11] : memref<72x128xf32, #tpu.memory_space<vmem>>, vector<1x32xf32>
    %c3 = arith.constant 3 : index
    %c0_12 = arith.constant 0 : index
    %8 = vector.load %arg4[%c3, %c0_12] : memref<72x128xf32, #tpu.memory_space<vmem>>, vector<1x32xf32>
    %c8 = arith.constant 8 : index
    %c0_13 = arith.constant 0 : index
    %9 = vector.load %arg4[%c8, %c0_13] : memref<72x128xf32, #tpu.memory_space<vmem>>, vector<32x16xf32>
    %c40 = arith.constant 40 : index
    %c0_14 = arith.constant 0 : index
    %10 = vector.load %arg4[%c40, %c0_14] : memref<72x128xf32, #tpu.memory_space<vmem>>, vector<16x32xf32>
    %c56 = arith.constant 56 : index
    %c0_15 = arith.constant 0 : index
    %11 = vector.load %arg4[%c56, %c0_15] : memref<72x128xf32, #tpu.memory_space<vmem>>, vector<16x32xf32>
    %cst = arith.constant dense<0.000000e+00> : vector<16xf32>
    %12 = vector.multi_reduction <add>, %1, %cst [1] : vector<16x32xf32> to vector<16xf32>
    %13 = vector.shape_cast %12 : vector<16xf32> to vector<16x1xf32>
    %cst_16 = arith.constant 3.200000e+01 : f32
    %14 = vector.broadcast %cst_16 : f32 to vector<16x1xf32>
    %15 = arith.divf %13, %14 : vector<16x1xf32>
    %16 = vector.broadcast %15 : vector<16x1xf32> to vector<16x32xf32>
    %17 = arith.subf %1, %16 : vector<16x32xf32>
    %18 = arith.mulf %17, %17 : vector<16x32xf32>
    %cst_17 = arith.constant dense<0.000000e+00> : vector<16xf32>
    %19 = vector.multi_reduction <add>, %18, %cst_17 [1] : vector<16x32xf32> to vector<16xf32>
    %20 = vector.shape_cast %19 : vector<16xf32> to vector<16x1xf32>
    %cst_18 = arith.constant 3.200000e+01 : f32
    %21 = vector.broadcast %cst_18 : f32 to vector<16x1xf32>
    %22 = arith.divf %20, %21 : vector<16x1xf32>
    %23 = vector.broadcast %15 : vector<16x1xf32> to vector<16x32xf32>
    %24 = arith.subf %1, %23 : vector<16x32xf32>
    %cst_19 = arith.constant 9.99999974E-6 : f32
    %25 = vector.broadcast %cst_19 : f32 to vector<16x1xf32>
    %26 = arith.addf %22, %25 : vector<16x1xf32>
    %27 = math.rsqrt %26 : vector<16x1xf32>
    %28 = vector.broadcast %27 : vector<16x1xf32> to vector<16x32xf32>
    %29 = arith.mulf %24, %28 : vector<16x32xf32>
    %30 = vector.broadcast %5 : vector<1x32xf32> to vector<16x32xf32>
    %31 = arith.mulf %29, %30 : vector<16x32xf32>
    %32 = vector.broadcast %6 : vector<1x32xf32> to vector<16x32xf32>
    %33 = arith.addf %31, %32 : vector<16x32xf32>
    %cst_20 = arith.constant dense<0.000000e+00> : vector<16x16xf32>
    %34 = tpu.matmul %33, %9, %cst_20 {dimension_numbers = #tpu.dot_dimension_numbers<[1], [0], [0], [1], [0, 0, 1, 1], [], []>} : vector<16x32xf32>, vector<32x16xf32>, vector<16x16xf32> -> vector<16x16xf32>
    %cst_21 = arith.constant 0.353553385 : f32
    %35 = vector.broadcast %cst_21 : f32 to vector<16x16xf32>
    %36 = arith.mulf %34, %35 : vector<16x16xf32>
    %cst_22 = arith.constant dense<0.000000e+00> : vector<16x32xf32>
    %37 = tpu.matmul %3, %10, %cst_22 {dimension_numbers = #tpu.dot_dimension_numbers<[1], [0], [0], [1], [0, 0, 1, 1], [], []>} : vector<16x16xf32>, vector<16x32xf32>, vector<16x32xf32> -> vector<16x32xf32>
    %38 = vector.extract_strided_slice %4 {offsets = [0, 0, 0], sizes = [1, 8, 8], strides = [1, 1, 1]} : vector<2x8x8xf32> to vector<1x8x8xf32>
    %39 = vector.shape_cast %38 : vector<1x8x8xf32> to vector<8x8xf32>
    %40 = vector.extract_strided_slice %36 {offsets = [0, 0], sizes = [8, 8], strides = [1, 1]} : vector<16x16xf32> to vector<8x8xf32>
    %41 = vector.extract_strided_slice %37 {offsets = [0, 0], sizes = [8, 8], strides = [1, 1]} : vector<16x32xf32> to vector<8x8xf32>
    %42 = vector.extract_strided_slice %37 {offsets = [0, 16], sizes = [8, 8], strides = [1, 1]} : vector<16x32xf32> to vector<8x8xf32>
    %cst_23 = arith.constant dense<0.000000e+00> : vector<8x8xf32>
    %43 = tpu.matmul %40, %41, %cst_23 {dimension_numbers = #tpu.dot_dimension_numbers<[1], [1], [0], [0], [0, 0, 1, 0], [], []>} : vector<8x8xf32>, vector<8x8xf32>, vector<8x8xf32> -> vector<8x8xf32>
    %44 = arith.addf %43, %39 : vector<8x8xf32>
    %cst_24 = arith.constant dense<0xFF800000> : vector<8xf32>
    %45 = vector.multi_reduction <maximumf>, %44, %cst_24 [1] : vector<8x8xf32> to vector<8xf32>
    %46 = vector.shape_cast %45 : vector<8xf32> to vector<8x1xf32>
    %47 = vector.broadcast %46 : vector<8x1xf32> to vector<8x8xf32>
    %48 = arith.subf %44, %47 : vector<8x8xf32>
    %49 = math.exp %48 : vector<8x8xf32>
    %cst_25 = arith.constant dense<0.000000e+00> : vector<8xf32>
    %50 = vector.multi_reduction <add>, %49, %cst_25 [1] : vector<8x8xf32> to vector<8xf32>
    %51 = vector.shape_cast %50 : vector<8xf32> to vector<8x1xf32>
    %52 = tpu.reciprocal %51 {approx = true} : vector<8x1xf32> -> vector<8x1xf32>
    %53 = vector.broadcast %52 : vector<8x1xf32> to vector<8x8xf32>
    %54 = arith.mulf %49, %53 : vector<8x8xf32>
    %cst_26 = arith.constant dense<0.000000e+00> : vector<8x8xf32>
    %55 = tpu.matmul %54, %42, %cst_26 {dimension_numbers = #tpu.dot_dimension_numbers<[1], [0], [0], [1], [0, 0, 1, 1], [], []>} : vector<8x8xf32>, vector<8x8xf32>, vector<8x8xf32> -> vector<8x8xf32>
    %56 = vector.extract_strided_slice %36 {offsets = [0, 8], sizes = [8, 8], strides = [1, 1]} : vector<16x16xf32> to vector<8x8xf32>
    %57 = vector.extract_strided_slice %37 {offsets = [0, 8], sizes = [8, 8], strides = [1, 1]} : vector<16x32xf32> to vector<8x8xf32>
    %58 = vector.extract_strided_slice %37 {offsets = [0, 24], sizes = [8, 8], strides = [1, 1]} : vector<16x32xf32> to vector<8x8xf32>
    %cst_27 = arith.constant dense<0.000000e+00> : vector<8x8xf32>
    %59 = tpu.matmul %56, %57, %cst_27 {dimension_numbers = #tpu.dot_dimension_numbers<[1], [1], [0], [0], [0, 0, 1, 0], [], []>} : vector<8x8xf32>, vector<8x8xf32>, vector<8x8xf32> -> vector<8x8xf32>
    %60 = arith.addf %59, %39 : vector<8x8xf32>
    %cst_28 = arith.constant dense<0xFF800000> : vector<8xf32>
    %61 = vector.multi_reduction <maximumf>, %60, %cst_28 [1] : vector<8x8xf32> to vector<8xf32>
    %62 = vector.shape_cast %61 : vector<8xf32> to vector<8x1xf32>
    %63 = vector.broadcast %62 : vector<8x1xf32> to vector<8x8xf32>
    %64 = arith.subf %60, %63 : vector<8x8xf32>
    %65 = math.exp %64 : vector<8x8xf32>
    %cst_29 = arith.constant dense<0.000000e+00> : vector<8xf32>
    %66 = vector.multi_reduction <add>, %65, %cst_29 [1] : vector<8x8xf32> to vector<8xf32>
    %67 = vector.shape_cast %66 : vector<8xf32> to vector<8x1xf32>
    %68 = tpu.reciprocal %67 {approx = true} : vector<8x1xf32> -> vector<8x1xf32>
    %69 = vector.broadcast %68 : vector<8x1xf32> to vector<8x8xf32>
    %70 = arith.mulf %65, %69 : vector<8x8xf32>
    %cst_30 = arith.constant dense<0.000000e+00> : vector<8x8xf32>
    %71 = tpu.matmul %70, %58, %cst_30 {dimension_numbers = #tpu.dot_dimension_numbers<[1], [0], [0], [1], [0, 0, 1, 1], [], []>} : vector<8x8xf32>, vector<8x8xf32>, vector<8x8xf32> -> vector<8x8xf32>
    %72 = tpu.concatenate %55, %71 in 1 : vector<8x8xf32>, vector<8x8xf32> -> vector<8x16xf32>
    %73 = vector.extract_strided_slice %4 {offsets = [1, 0, 0], sizes = [1, 8, 8], strides = [1, 1, 1]} : vector<2x8x8xf32> to vector<1x8x8xf32>
    %74 = vector.shape_cast %73 : vector<1x8x8xf32> to vector<8x8xf32>
    %75 = vector.extract_strided_slice %36 {offsets = [8, 0], sizes = [8, 8], strides = [1, 1]} : vector<16x16xf32> to vector<8x8xf32>
    %76 = vector.extract_strided_slice %37 {offsets = [8, 0], sizes = [8, 8], strides = [1, 1]} : vector<16x32xf32> to vector<8x8xf32>
    %77 = vector.extract_strided_slice %37 {offsets = [8, 16], sizes = [8, 8], strides = [1, 1]} : vector<16x32xf32> to vector<8x8xf32>
    %cst_31 = arith.constant dense<0.000000e+00> : vector<8x8xf32>
    %78 = tpu.matmul %75, %76, %cst_31 {dimension_numbers = #tpu.dot_dimension_numbers<[1], [1], [0], [0], [0, 0, 1, 0], [], []>} : vector<8x8xf32>, vector<8x8xf32>, vector<8x8xf32> -> vector<8x8xf32>
    %79 = arith.addf %78, %74 : vector<8x8xf32>
    %cst_32 = arith.constant dense<0xFF800000> : vector<8xf32>
    %80 = vector.multi_reduction <maximumf>, %79, %cst_32 [1] : vector<8x8xf32> to vector<8xf32>
    %81 = vector.shape_cast %80 : vector<8xf32> to vector<8x1xf32>
    %82 = vector.broadcast %81 : vector<8x1xf32> to vector<8x8xf32>
    %83 = arith.subf %79, %82 : vector<8x8xf32>
    %84 = math.exp %83 : vector<8x8xf32>
    %cst_33 = arith.constant dense<0.000000e+00> : vector<8xf32>
    %85 = vector.multi_reduction <add>, %84, %cst_33 [1] : vector<8x8xf32> to vector<8xf32>
    %86 = vector.shape_cast %85 : vector<8xf32> to vector<8x1xf32>
    %87 = tpu.reciprocal %86 {approx = true} : vector<8x1xf32> -> vector<8x1xf32>
    %88 = vector.broadcast %87 : vector<8x1xf32> to vector<8x8xf32>
    %89 = arith.mulf %84, %88 : vector<8x8xf32>
    %cst_34 = arith.constant dense<0.000000e+00> : vector<8x8xf32>
    %90 = tpu.matmul %89, %77, %cst_34 {dimension_numbers = #tpu.dot_dimension_numbers<[1], [0], [0], [1], [0, 0, 1, 1], [], []>} : vector<8x8xf32>, vector<8x8xf32>, vector<8x8xf32> -> vector<8x8xf32>
    %91 = vector.extract_strided_slice %36 {offsets = [8, 8], sizes = [8, 8], strides = [1, 1]} : vector<16x16xf32> to vector<8x8xf32>
    %92 = vector.extract_strided_slice %37 {offsets = [8, 8], sizes = [8, 8], strides = [1, 1]} : vector<16x32xf32> to vector<8x8xf32>
    %93 = vector.extract_strided_slice %37 {offsets = [8, 24], sizes = [8, 8], strides = [1, 1]} : vector<16x32xf32> to vector<8x8xf32>
    %cst_35 = arith.constant dense<0.000000e+00> : vector<8x8xf32>
    %94 = tpu.matmul %91, %92, %cst_35 {dimension_numbers = #tpu.dot_dimension_numbers<[1], [1], [0], [0], [0, 0, 1, 0], [], []>} : vector<8x8xf32>, vector<8x8xf32>, vector<8x8xf32> -> vector<8x8xf32>
    %95 = arith.addf %94, %74 : vector<8x8xf32>
    %cst_36 = arith.constant dense<0xFF800000> : vector<8xf32>
    %96 = vector.multi_reduction <maximumf>, %95, %cst_36 [1] : vector<8x8xf32> to vector<8xf32>
    %97 = vector.shape_cast %96 : vector<8xf32> to vector<8x1xf32>
    %98 = vector.broadcast %97 : vector<8x1xf32> to vector<8x8xf32>
    %99 = arith.subf %95, %98 : vector<8x8xf32>
    %100 = math.exp %99 : vector<8x8xf32>
    %cst_37 = arith.constant dense<0.000000e+00> : vector<8xf32>
    %101 = vector.multi_reduction <add>, %100, %cst_37 [1] : vector<8x8xf32> to vector<8xf32>
    %102 = vector.shape_cast %101 : vector<8xf32> to vector<8x1xf32>
    %103 = tpu.reciprocal %102 {approx = true} : vector<8x1xf32> -> vector<8x1xf32>
    %104 = vector.broadcast %103 : vector<8x1xf32> to vector<8x8xf32>
    %105 = arith.mulf %100, %104 : vector<8x8xf32>
    %cst_38 = arith.constant dense<0.000000e+00> : vector<8x8xf32>
    %106 = tpu.matmul %105, %93, %cst_38 {dimension_numbers = #tpu.dot_dimension_numbers<[1], [0], [0], [1], [0, 0, 1, 1], [], []>} : vector<8x8xf32>, vector<8x8xf32>, vector<8x8xf32> -> vector<8x8xf32>
    %107 = tpu.concatenate %90, %106 in 1 : vector<8x8xf32>, vector<8x8xf32> -> vector<8x16xf32>
    %108 = tpu.concatenate %72, %107 in 0 : vector<8x16xf32>, vector<8x16xf32> -> vector<16x16xf32>
    %cst_39 = arith.constant dense<0.000000e+00> : vector<16x32xf32>
    %109 = tpu.matmul %108, %11, %cst_39 {dimension_numbers = #tpu.dot_dimension_numbers<[1], [0], [0], [1], [0, 0, 1, 1], [], []>} : vector<16x16xf32>, vector<16x32xf32>, vector<16x32xf32> -> vector<16x32xf32>
    %c0_40 = arith.constant 0 : index
    %110 = memref.load %arg7[%c0_40] : memref<2xf32, #tpu.memory_space<smem>>
    %c1_41 = arith.constant 1 : index
    %111 = memref.load %arg7[%c1_41] : memref<2xf32, #tpu.memory_space<smem>>
    %112 = vector.broadcast %110 : f32 to vector<16x32xf32>
    %113 = arith.mulf %109, %112 : vector<16x32xf32>
    %114 = arith.addf %113, %1 : vector<16x32xf32>
    %cst_42 = arith.constant dense<0.000000e+00> : vector<16xf32>
    %115 = vector.multi_reduction <add>, %114, %cst_42 [1] : vector<16x32xf32> to vector<16xf32>
    %116 = vector.shape_cast %115 : vector<16xf32> to vector<16x1xf32>
    %cst_43 = arith.constant 3.200000e+01 : f32
    %117 = vector.broadcast %cst_43 : f32 to vector<16x1xf32>
    %118 = arith.divf %116, %117 : vector<16x1xf32>
    %119 = vector.broadcast %118 : vector<16x1xf32> to vector<16x32xf32>
    %120 = arith.subf %114, %119 : vector<16x32xf32>
    %121 = arith.mulf %120, %120 : vector<16x32xf32>
    %cst_44 = arith.constant dense<0.000000e+00> : vector<16xf32>
    %122 = vector.multi_reduction <add>, %121, %cst_44 [1] : vector<16x32xf32> to vector<16xf32>
    %123 = vector.shape_cast %122 : vector<16xf32> to vector<16x1xf32>
    %cst_45 = arith.constant 3.200000e+01 : f32
    %124 = vector.broadcast %cst_45 : f32 to vector<16x1xf32>
    %125 = arith.divf %123, %124 : vector<16x1xf32>
    %126 = vector.broadcast %118 : vector<16x1xf32> to vector<16x32xf32>
    %127 = arith.subf %114, %126 : vector<16x32xf32>
    %cst_46 = arith.constant 9.99999974E-6 : f32
    %128 = vector.broadcast %cst_46 : f32 to vector<16x1xf32>
    %129 = arith.addf %125, %128 : vector<16x1xf32>
    %130 = math.rsqrt %129 : vector<16x1xf32>
    %131 = vector.broadcast %130 : vector<16x1xf32> to vector<16x32xf32>
    %132 = arith.mulf %127, %131 : vector<16x32xf32>
    %133 = vector.broadcast %7 : vector<1x32xf32> to vector<16x32xf32>
    %134 = arith.mulf %132, %133 : vector<16x32xf32>
    %135 = vector.broadcast %8 : vector<1x32xf32> to vector<16x32xf32>
    %136 = arith.addf %134, %135 : vector<16x32xf32>
    %c0_47 = arith.constant 0 : index
    %c0_48 = arith.constant 0 : index
    %137 = vector.load %arg5[%c0_47, %c0_48] : memref<32x128xf32, #tpu.memory_space<vmem>>, vector<32x128xf32>
    %cst_49 = arith.constant dense<0.000000e+00> : vector<16x128xf32>
    %138 = tpu.matmul %136, %137, %cst_49 {dimension_numbers = #tpu.dot_dimension_numbers<[1], [0], [0], [1], [0, 0, 1, 1], [], []>} : vector<16x32xf32>, vector<32x128xf32>, vector<16x128xf32> -> vector<16x128xf32>
    %cst_50 = arith.constant 5.000000e-01 : f32
    %139 = vector.broadcast %cst_50 : f32 to vector<16x128xf32>
    %140 = arith.mulf %139, %138 : vector<16x128xf32>
    %cst_51 = arith.constant 4.471500e-02 : f32
    %141 = vector.broadcast %cst_51 : f32 to vector<16x128xf32>
    %142 = arith.mulf %141, %138 : vector<16x128xf32>
    %143 = arith.mulf %142, %138 : vector<16x128xf32>
    %144 = arith.mulf %143, %138 : vector<16x128xf32>
    %145 = arith.addf %138, %144 : vector<16x128xf32>
    %cst_52 = arith.constant 0.797884583 : f32
    %146 = vector.broadcast %cst_52 : f32 to vector<16x128xf32>
    %147 = arith.mulf %146, %145 : vector<16x128xf32>
    %148 = math.tanh %147 : vector<16x128xf32>
    %cst_53 = arith.constant 1.000000e+00 : f32
    %149 = vector.broadcast %cst_53 : f32 to vector<16x128xf32>
    %150 = arith.addf %149, %148 : vector<16x128xf32>
    %151 = arith.mulf %140, %150 : vector<16x128xf32>
    %c0_54 = arith.constant 0 : index
    %c0_55 = arith.constant 0 : index
    %152 = vector.load %arg6[%c0_54, %c0_55] : memref<128x32xf32, #tpu.memory_space<vmem>>, vector<128x32xf32>
    %cst_56 = arith.constant dense<0.000000e+00> : vector<16x32xf32>
    %153 = tpu.matmul %151, %152, %cst_56 {dimension_numbers = #tpu.dot_dimension_numbers<[1], [0], [0], [1], [0, 0, 1, 1], [], []>} : vector<16x128xf32>, vector<128x32xf32>, vector<16x32xf32> -> vector<16x32xf32>
    %154 = vector.broadcast %111 : f32 to vector<16x32xf32>
    %155 = arith.mulf %153, %154 : vector<16x32xf32>
    %156 = arith.addf %155, %114 : vector<16x32xf32>
    %157 = vector.shape_cast %156 : vector<16x32xf32> to vector<2x8x32xf32>
    %c0_57 = arith.constant 0 : index
    %c0_58 = arith.constant 0 : index
    %c0_59 = arith.constant 0 : index
    %158 = vector.load %arg8[%c0_57, %c0_58, %c0_59] : memref<2x8x32xf32, #tpu.memory_space<vmem>>, vector<2x8x32xf32>
    tpu.vector_store %arg8[%c0_57, %c0_58, %c0_59], %157 {strides = array<i32>} : memref<2x8x32xf32, #tpu.memory_space<vmem>>, vector<2x8x32xf32>,
    return
  }
  func.func @transform_0(%arg0: i32) -> (i32, i32, i32) {
    %c0_i32 = arith.constant 0 : i32
    %c0_i32_0 = arith.constant 0 : i32
    %c0_i32_1 = arith.constant 0 : i32
    return %arg0, %c0_i32, %c0_i32_0 : i32, i32, i32
  }
  func.func @transform_1(%arg0: i32) -> (i32, i32, i32) {
    %c0_i32 = arith.constant 0 : i32
    %c0_i32_0 = arith.constant 0 : i32
    %c0_i32_1 = arith.constant 0 : i32
    return %arg0, %c0_i32, %c0_i32_0 : i32, i32, i32
  }
  func.func @transform_2(%arg0: i32) -> (i32, i32, i32) {
    %c0_i32 = arith.constant 0 : i32
    %c0_i32_0 = arith.constant 0 : i32
    %c0_i32_1 = arith.constant 0 : i32
    return %arg0, %c0_i32, %c0_i32_0 : i32, i32, i32
  }
  func.func @transform_3(%arg0: i32) -> (i32, i32) {
    %c0_i32 = arith.constant 0 : i32
    %c0_i32_0 = arith.constant 0 : i32
    %c0_i32_1 = arith.constant 0 : i32
    return %c0_i32, %c0_i32_0 : i32, i32
  }
  func.func @transform_4(%arg0: i32) -> (i32, i32) {
    %c0_i32 = arith.constant 0 : i32
    %c0_i32_0 = arith.constant 0 : i32
    %c0_i32_1 = arith.constant 0 : i32
    return %c0_i32, %c0_i32_0 : i32, i32
  }
  func.func @transform_5(%arg0: i32) -> (i32, i32) {
    %c0_i32 = arith.constant 0 : i32
    %c0_i32_0 = arith.constant 0 : i32
    %c0_i32_1 = arith.constant 0 : i32
    return %c0_i32, %c0_i32_0 : i32, i32
  }
  func.func @transform_6(%arg0: i32) -> i32 {
    %c0_i32 = arith.constant 0 : i32
    %c0_i32_0 = arith.constant 0 : i32
    return %c0_i32 : i32
  }
  func.func @transform_7(%arg0: i32) -> (i32, i32, i32) {
    %c0_i32 = arith.constant 0 : i32
    %c0_i32_0 = arith.constant 0 : i32
    %c0_i32_1 = arith.constant 0 : i32
    return %arg0, %c0_i32, %c0_i32_0 : i32, i32, i32
  }
}

</mosaic_0001>

<bundles_post_ra>
// kernel: tpu_custom_call.1
= control target key start
LH: loop header
LB: loop body
LE: loop exit
PB: predicated region body
PF: predicated region fallthrough
CT: control target
= control target key end

     0   :  { %12 = vsyncpa [#allocation4], 0  ;;  %s1881_s0 = inlined_call_operand.vmem [shape: f32[2,8,32], index: 0, kind: input, shape index: {}]   ;;  %s1882_s1 = inlined_call_operand.vmem [shape: f32[2,8,16], index: 1, kind: input, shape index: {}]   ;;  %s1883_s2 = inlined_call_operand.vmem [shape: f32[2,8,8], index: 2, kind: input, shape index: {}]   ;;  %s1884_s3 = inlined_call_operand.vmem [shape: f32[72,128], index: 3, kind: input, shape index: {}]   ;;  %s1885_s4 = inlined_call_operand.vmem [shape: f32[32,128], index: 4, kind: input, shape index: {}]   ;;  %s1886_s5 = inlined_call_operand.vmem [shape: f32[128,32], index: 5, kind: input, shape index: {}]   ;;  %s1887_s6 = inlined_call_operand.vmem [shape: f32[2], index: 6, kind: input, shape index: {}]   ;;  %s1888_s7 = inlined_call_operand.hbm [shape: f32[2,8,32], index: 7, kind: output, shape index: {}]  }
   0x1   :  { %13 = vsyncpa [#allocation3], 0  ;;  %s32_s26 = sshll.u32 %s1887_s6, 4  ;;  %s33_s26 = int_to_ptr.vmem [resolvable:$true] %s32_s26 }
   0x2   :  { %s1557_s27 = scalar_lea.vmem %s33_s26, 16  ;;  %p1562_p1 = scmp.lt.s32.totalorder %s33_s26, %s33_s26 }
   0x3   :  { %p1558_p0 = scmp.ne.s32.totalorder %s33_s26, %s1557_s27  ;;  %p1563_p2 = scmp.lt.s32.totalorder %s1557_s27, %s1557_s27 }
   0x5   :  { %p1564_p3 = por %p1563_p2, %p1562_p1 }
   0x7   :  { %p1565_p4 = pnand %p1564_p3, %p1558_p0 }
   0x9   :  { %1568 = shalt.err (!%p1565_p4)
}
   0xa   :  { %s1595_s28 = smov [#allocation2]  }
   0xb   :  { %35 = dma.vmem_to_smem %s33_s26, 16, %s1595_s28, [#allocation4]  }
   0xc   :  { %1591 = dma.done.wait [#allocation4], 16  }
   0xd   :  { %1592 = vsyncadd [#allocation4], 4294967280 }
   0xe   :  { %39 = sfence }
   0xf   :  { %v1650_v0 = vld [vmem:[%s1881_s0] sm:$0xff]  ;;  %vm58_vm0 = vcmask 261120   ;;  %v1655_v1 = vld [vmem:[%s1881_s0 + $0x8] sm:$0xff]  ;;  %v51_v15 = vld [vmem:[%s1884_s3 + $0x10] sm:$0xff]  ;;  %vm181_vm1 = vcmask 130048   ;;  %v1596_v41 = vmov 0.0  }
  0x10   :  { %v59_v2 = vsel %vm58_vm0, %v1650_v0, 0.0  ;;  %v62_v3 = vsel %vm58_vm0, %v1655_v1, 0.0  ;;  %v50_v14 = vld [vmem:[%s1884_s3 + $0x8] sm:$0xff]  ;;  %v52_v16 = vld [vmem:[%s1884_s3 + $0x18] sm:$0xff]  ;;  %v53_v18 = vld [vmem:[%s1884_s3 + $0x20] sm:$0xff]  ;;  %1391 = vmatprep.subr.mxu1 %v1596_v41  ;;  %vm1597_vm2 = vmmov 0  }
  0x11   :  { %60 = vadd.xlane.f32.xlu0 %v59_v2  ;;  %v1464_v17 = vpack.c.bf16 %v51_v15, %v50_v14  ;;  %v1468_v19 = vpack.c.bf16 %v53_v18, %v52_v16  ;;  %v54_v20 = vld [vmem:[%s1884_s3 + $0x28] sm:$0xff]  ;;  %v55_v21 = vld [vmem:[%s1884_s3 + $0x30] sm:$0xff]  ;;  %v1274_v30 = vld [vmem:[%s1884_s3] ss:$0 sm:$0xff]  ;;  %1393 = vmatprep.mubr.msk.f32.mxu1 %vm1597_vm2, %v1596_v41  ;;  %vm263_vm3 = vcmask 64512   ;;  %s1599_s30 = smov 112  }
  0x12   :  { %v1472_v22 = vpack.c.bf16 %v55_v21, %v54_v20  ;;  %v1275_v32 = vld [vmem:[%s1884_s3 + $0x1] ss:$0 sm:$0xff]  ;;  %v43_v40 = vld [vmem:[%s1882_s1 + $0x8] sm:$0xff]  ;;  %s1601_s12 = smov 8   ;;  %s1011_s13 = sld [smem:[#allocation2]] }
  0x13   :  { %1465 = vmatprep.subr.bf16.mxu0 %v1464_v17  ;;  %v42_v39 = vld [vmem:[%s1882_s1] sm:$0xff]  ;;  %s1598_s1 = smov 120   ;;  %v45_v55 = vld [vmem:[%s1883_s2 + $0x8] sm:$0xff]  ;;  %s1602_s28 = smov [#allocation5]  }
  0x14   :  { %1467 = vmatpush3.bf16.msra.mxu0 %v1464_v17  ;;  %v44_v48 = vld [vmem:[%s1883_s2] sm:$0xff]  ;;  %s1600_s2 = smov 104   ;;  %s1262_s29 = sshll.u32 %s1602_s28, 4  ;;  %s1263_s29 = int_to_ptr.vmem [resolvable:$true] %s1262_s29 }
  0x15   :  { %63 = vadd.xlane.f32.xlu0 %v62_v3  ;;  %1469 = vmatprep.subr.bf16.mxu0 %v1468_v19  ;;  %p1574_p6 = scmp.lt.s32.totalorder %s1263_s29, %s1263_s29 }
  0x18   :  { %1471 = vmatpush3.bf16.msra.mxu0 %v1468_v19 }
  0x19   :  { %1473 = vmatprep.subr.bf16.mxu0 %v1472_v22 }
  0x9e   :  { %v61_v4 = vpop.xlane.xlu0 %60 }
  0x9f   :  { %v66_v5 = vmul.f32 0.03125, %v61_v4 }
  0xa1   :  { %v68_v6 = vsub.f32 %v1650_v0, %v66_v5 }
  0xa2   :  { %v64_v7 = vpop.xlane.xlu0 %63 }
  0xa3   :  { %v67_v8 = vmul.f32 0.03125, %v64_v7  ;;  %v70_v9 = vmul.f32 %v68_v6, %v68_v6 }
  0xa5   :  { %v69_v10 = vsub.f32 %v1655_v1, %v67_v8  ;;  %v72_v11 = vsel %vm58_vm0, %v70_v9, 0.0 }
  0xa6   :  { %73 = vadd.xlane.f32.xlu1 %v72_v11 }
  0xa7   :  { %v71_v12 = vmul.f32 %v69_v10, %v69_v10 }
  0xa9   :  { %v75_v13 = vsel %vm58_vm0, %v71_v12, 0.0 }
  0xaa   :  { %76 = vadd.xlane.f32.xlu1 %v75_v13 }
 0x133   :  { %v74_v23 = vpop.xlane.xlu1 %73 }
 0x134   :  { %v78_v24 = vmul.f32 0.03125, %v74_v23 }
 0x136   :  { %v80_v25 = vadd.f32 1e-05, %v78_v24 }
 0x137   :  { %v77_v26 = vpop.xlane.xlu1 %76 }
 0x138   :  { %1529 = vrsqrt.f32 %v80_v25  ;;  %v79_v27 = vmul.f32 0.03125, %v77_v26 }
 0x13a   :  { %v81_v28 = vadd.f32 1e-05, %v79_v27 }
 0x13c   :  { %1531 = vrsqrt.f32 %v81_v28 }
 0x142   :  { %v1530_v29 = vpop.eup %1529 }
 0x143   :  { %v84_v31 = vmul.f32 %v1530_v29, %v68_v6 }
 0x145   :  { %v90_v33 = vmul.f32 %v1274_v30, %v84_v31 }
 0x146   :  { %v1532_v34 = vpop.eup %1531 }
 0x147   :  { %v85_v35 = vmul.f32 %v1532_v34, %v69_v10  ;;  %v96_v36 = vadd.f32 %v1275_v32, %v90_v33 }
 0x149   :  { %v91_v37 = vmul.f32 %v1274_v30, %v85_v35  ;;  %1361 = vmatprep.mubr.msk.f32.mxu0 %vm58_vm0, %v96_v36 }
 0x14b   :  { %v97_v38 = vadd.f32 %v1275_v32, %v91_v37 }
 0x14d   :  { %1362 = vmatmul.mubr.msk.f32.vlgmr.msra.gmra.mrb[0].mxu0 %vm58_vm0, %v97_v38 }
 0x14e   :  { %1475 = vmatpush3.bf16.msra.mxu0 %v1472_v22  ;;  %1368 = vmatprep.mubr.msk.f32.mxu0 %vm181_vm1, %v42_v39 }
 0x14f   :  { %1371 = vmatprep.subr.mxu0 %v1596_v41 }
 0x151   :  { %1369 = vmatmul.mubr.msk.f32.vlgmr.msra.gmra.mrb[2].mxu0 %vm181_vm1, %v43_v40 }
 0x152   :  { %1373 = vmatprep.mubr.msk.f32.mxu0 %vm1597_vm2, %v1596_v41 }
 0x220   :  { %v1363_v42 = vpop.f32.mrb[0].mxu0 }
 0x221   :  { %v170_v43 = vpop.f32.mrb[1].mxu0  ;;  %v180_v46 = vmul.f32 0.35355338, %v1363_v42 }
 0x222   :  { %v179_v47 = vmul.f32 0.35355338, %v170_v43 }
 0x224   :  { %v1705_v44 = vpop.f32.mrb[2].mxu0 }
 0x225   :  { %v1707_v45 = vpop.f32.mrb[3].mxu0  ;;  %1392 = vmatpush3.xpose.msk.msra.mxu1 %vm263_vm3, %v1705_v44 }
 0x226   :  { %429 = vrot.lane.b32.xlu1 %v1707_v45, %s1598_s1  ;;  %1372 = vmatpush3.xpose.msk.msra.mxu0 %vm263_vm3, %v1707_v45 }
 0x227   :  { %1376 = vmatprep.subr.mxu0 %v1596_v41  ;;  %1401 = vmatprep.subr.mxu1 %v1596_v41 }
 0x228   :  { %1394 = vmatmul.mubr.msk.f32.vlgmr.msra.gmra.mrb[0].mxu1 %vm263_vm3, %v180_v46 }
 0x229   :  { %1374 = vmatmul.mubr.msk.f32.vlgmr.msra.gmra.mrb[4].mxu0 %vm263_vm3, %v179_v47  ;;  %1403 = vmatprep.mubr.msk.f32.mxu1 %vm1597_vm2, %v1596_v41 }
 0x22a   :  { %427 = vrot.lane.b32.xlu1 %v179_v47, %s1598_s1  ;;  %1378 = vmatprep.mubr.msk.f32.mxu0 %vm1597_vm2, %v1596_v41  ;;  %v56_v47 = vld [vmem:[%s1884_s3 + $0x38] sm:$0xff] }
 0x298   :  { %v430_v2 = vpop.permute.xlu1 %429 }
 0x29c   :  { %v428_v3 = vpop.permute.xlu1 %427 }
 0x2fb   :  { %v669_v49 = vpop.f32.mrb[0].mxu1 }
 0x2fc   :  { %v336_v50 = vpop.f32.mrb[4].mxu0  ;;  %v1395_v51 = vpop.f32.mrb[1].mxu1  ;;  %v670_v56 = vadd.f32 %v669_v49, %v45_v55 }
 0x2fd   :  { %v337_v52 = vadd.f32 %v336_v50, %v44_v48  ;;  %v1375_v53 = vpop.f32.mrb[5].mxu0 }
 0x2fe   :  { %v673_v57 = vsel %vm263_vm3, %v670_v56, -inf }
 0x2ff   :  { %v340_v54 = vsel %vm263_vm3, %v337_v52, -inf }
 0x300   :  { %341 = vmax.xlane.f32.xlu0 %v340_v54 }
 0x316   :  { %351 = vrot.lane.b32.xlu0 %v1707_v45, %s1599_s30 }
 0x31a   :  { %760 = vrot.lane.b32.xlu0 %v180_v46, %s1598_s1 }
 0x339   :  { %674 = vmax.xlane.f32.xlu0 %v673_v57 }
 0x38d   :  { %v342_v58 = vpop.xlane.xlu0 %341 }
 0x38e   :  { %v343_v59 = vsub.f32 %v337_v52, %v342_v58 }
 0x390   :  { %v344_v60 = vmul.f32 1.442695, %v343_v59  ;;  %v1013_v59 = vstv %s1011_s13 }
 0x391   :  { %v352_v61 = vpop.permute.xlu0 %351 }
 0x392   :  { %1533 = vpow2.f32 %v344_v60  ;;  %1377 = vmatpush3.msra.mxu0 %v352_v61 }
 0x393   :  { %1381 = vmatprep.subr.mxu0 %v1596_v41 }
 0x395   :  { %v761_v6 = vpop.permute.xlu0 %760 }
 0x39c   :  { %v1534_v62 = vpop.eup %1533 }
 0x39d   :  { %v346_v63 = vsel %vm263_vm3, %v1534_v62, 0.0 }
 0x39e   :  { %347 = vadd.xlane.f32.xlu1 %v346_v63 }
 0x3af   :  { %762 = vrot.lane.b32.xlu1 %v1705_v44, %s1598_s1 }
 0x3c6   :  { %v675_v9 = vpop.xlane.xlu0 %674 }
 0x3c7   :  { %v676_v10 = vsub.f32 %v670_v56, %v675_v9 }
 0x3c9   :  { %v677_v11 = vmul.f32 1.442695, %v676_v10 }
 0x42b   :  { %v348_v4 = vpop.xlane.xlu1 %347 }
 0x42c   :  { %1535 = vrcp.f32 %v348_v4 }
 0x42d   :  { %1537 = vpow2.f32 %v677_v11 }
 0x42f   :  { %v763_v5 = vpop.permute.xlu1 %762 }
 0x430   :  { %1402 = vmatpush3.xpose.msk.msra.mxu1 %vm263_vm3, %v763_v5 }
 0x433   :  { %1404 = vmatmul.mubr.msk.f32.vlgmr.msra.gmra.mrb[2].mxu1 %vm263_vm3, %v761_v6 }
 0x436   :  { %v1536_v7 = vpop.eup %1535 }
 0x437   :  { %v350_v8 = vmul.f32 %v1536_v7, %v1534_v62  ;;  %v1538_v22 = vpop.eup %1537 }
 0x438   :  { %v679_v23 = vsel %vm263_vm3, %v1538_v22, 0.0 }
 0x439   :  { %1379 = vmatmul.mubr.msk.f32.vlgmr.msra.gmra.mrb[6].mxu0 %vm263_vm3, %v350_v8 }
 0x43a   :  { %1382 = vmatpush3.xpose.msk.msra.mxu0 %vm263_vm3, %v430_v2  ;;  %1383 = vmatprep.mubr.msk.f32.mxu0 %vm1597_vm2, %v1596_v41 }
 0x43b   :  { %1386 = vmatprep.subr.mxu0 %v1596_v41 }
 0x43d   :  { %1384 = vmatmul.mubr.msk.f32.vlgmr.msra.gmra.mrb[8].mxu0 %vm263_vm3, %v428_v3 }
 0x43e   :  { %1388 = vmatprep.mubr.msk.f32.mxu0 %vm1597_vm2, %v1596_v41 }
 0x506   :  { %v834_v12 = vpop.f32.mrb[2].mxu1 }
 0x507   :  { %v835_v13 = vadd.f32 %v834_v12, %v45_v55  ;;  %v1405_v14 = vpop.f32.mrb[3].mxu1 }
 0x508   :  { %v1056_v14 = vld [vmem:[%s1885_s4] sm:$0xff] }
 0x509   :  { %v838_v15 = vsel %vm263_vm3, %v835_v13, -inf }
 0x50a   :  { %839 = vmax.xlane.f32.xlu0 %v838_v15  ;;  %v1057_v15 = vld [vmem:[%s1885_s4 + $0x8] sm:$0xff] }
 0x50c   :  { %v1750_v16 = vpop.f32.mrb[6].mxu0 }
 0x50d   :  { %v1380_v17 = vpop.f32.mrb[7].mxu0 }
 0x50e   :  { %v1058_v17 = vld [vmem:[%s1885_s4 + $0x10] sm:$0xff] }
 0x510   :  { %v501_v18 = vpop.f32.mrb[8].mxu0 }
 0x511   :  { %v502_v19 = vadd.f32 %v501_v18, %v44_v48  ;;  %v1385_v20 = vpop.f32.mrb[9].mxu0  ;;  %v57_v48 = vld [vmem:[%s1884_s3 + $0x40] sm:$0xff]  ;;  %v1059_v18 = vld [vmem:[%s1885_s4 + $0x18] sm:$0xff] }
 0x512   :  { %v1476_v49 = vpack.c.bf16 %v57_v48, %v56_v47  ;;  %v1159_v20 = vld [vmem:[%s1886_s5] sm:$0xff]  ;;  %v1166_v47 = vld [vmem:[%s1886_s5 + $0x38] sm:$0xff] }
 0x513   :  { %v505_v21 = vsel %vm263_vm3, %v502_v19, -inf }
 0x514   :  { %506 = vmax.xlane.f32.xlu1 %v505_v21  ;;  %1477 = vmatprep.subr.bf16.mxu1 %v1476_v49  ;;  %v1160_v21 = vld [vmem:[%s1886_s5 + $0x8] sm:$0xff] }
 0x515   :  { %1479 = vmatpush3.bf16.msra.mxu1 %v1476_v49  ;;  %v1167_v49 = vld [vmem:[%s1886_s5 + $0x40] sm:$0xff] }
 0x518   :  { %680 = vadd.xlane.f32.xlu1 %v679_v23 }
 0x529   :  { %516 = vrot.lane.b32.xlu1 %v1707_v45, %s1600_s2 }
 0x52d   :  { %849 = vrot.lane.b32.xlu1 %v1705_v44, %s1600_s2 }
 0x597   :  { %v840_v24 = vpop.xlane.xlu0 %839 }
 0x598   :  { %v841_v25 = vsub.f32 %v835_v13, %v840_v24 }
 0x59a   :  { %v842_v26 = vmul.f32 1.442695, %v841_v25 }
 0x59c   :  { %1539 = vpow2.f32 %v842_v26 }
 0x5a1   :  { %v507_v27 = vpop.xlane.xlu1 %506 }
 0x5a2   :  { %v508_v28 = vsub.f32 %v502_v19, %v507_v27  ;;  %v1484_v19 = vpack.c.bf16 %v1059_v18, %v1058_v17 }
 0x5a4   :  { %v509_v29 = vmul.f32 1.442695, %v508_v28 }
 0x5a5   :  { %v681_v30 = vpop.xlane.xlu1 %680 }
 0x5a6   :  { %v1540_v31 = vpop.eup %1539  ;;  %1541 = vpow2.f32 %v509_v29 }
 0x5a7   :  { %v844_v32 = vsel %vm263_vm3, %v1540_v31, 0.0 }
 0x5a8   :  { %845 = vadd.xlane.f32.xlu0 %v844_v32  ;;  %v1296_v32 = vld [vmem:[%s1884_s3 + $0x3] ss:$0 sm:$0xff] }
 0x5a9   :  { %v517_v33 = vpop.permute.xlu1 %516 }
 0x5aa   :  { %1387 = vmatpush3.msra.mxu0 %v517_v33 }
 0x5ab   :  { %1396 = vmatprep.subr.mxu0 %v1596_v41 }
 0x5b0   :  { %v1542_v34 = vpop.eup %1541 }
 0x5b1   :  { %v511_v35 = vsel %vm263_vm3, %v1542_v34, 0.0 }
 0x5b2   :  { %512 = vadd.xlane.f32.xlu0 %v511_v35 }
 0x5c8   :  { %684 = vrot.lane.b32.xlu0 %v1705_v44, %s1599_s30  ;;  %v850_v44 = vpop.permute.xlu1 %849  ;;  %s1569_s30 = scalar_lea.vmem %s1263_s29, 256 }
 0x5c9   :  { %p1570_p5 = scmp.ne.s32.totalorder %s1263_s29, %s1569_s30  ;;  %p1575_p7 = scmp.lt.s32.totalorder %s1569_s30, %s1569_s30 }
 0x5cb   :  { %p1576_p8 = por %p1575_p7, %p1574_p6 }
 0x5cd   :  { %p1577_p9 = pnand %p1576_p8, %p1570_p5 }
 0x635   :  { %v846_v36 = vpop.xlane.xlu0 %845 }
 0x63f   :  { %v513_v37 = vpop.xlane.xlu0 %512 }
 0x640   :  { %1543 = vrcp.f32 %v513_v37 }
 0x641   :  { %1545 = vrcp.f32 %v681_v30  ;;  %v1295_v30 = vld [vmem:[%s1884_s3 + $0x2] ss:$0 sm:$0xff] }
 0x642   :  { %1547 = vrcp.f32 %v846_v36 }
 0x643   :  { %v685_v42 = vpop.permute.xlu0 %684 }
 0x64a   :  { %v1544_v38 = vpop.eup %1543 }
 0x64b   :  { %v515_v39 = vmul.f32 %v1544_v38, %v1542_v34  ;;  %v1546_v40 = vpop.eup %1545 }
 0x64c   :  { %v683_v43 = vmul.f32 %v1546_v40, %v1538_v22  ;;  %v1548_v45 = vpop.eup %1547  ;;  %v1488_v22 = vpack.c.bf16 %v1160_v21, %v1159_v20  ;;  %v1162_v40 = vld [vmem:[%s1886_s5 + $0x18] sm:$0xff] }
 0x64d   :  { %1389 = vmatmul.mubr.msk.f32.vlgmr.msra.gmra.mrb[10].mxu0 %vm263_vm3, %v515_v39  ;;  %v848_v46 = vmul.f32 %v1548_v45, %v1540_v31  ;;  %v1161_v39 = vld [vmem:[%s1886_s5 + $0x10] sm:$0xff]  ;;  %v1164_v45 = vld [vmem:[%s1886_s5 + $0x28] sm:$0xff] }
 0x64e   :  { %1397 = vmatpush3.msra.mxu0 %v685_v42  ;;  %1398 = vmatprep.mubr.msk.f32.mxu0 %vm1597_vm2, %v1596_v41  ;;  %v1492_v42 = vpack.c.bf16 %v1162_v40, %v1161_v39 }
 0x64f   :  { %1406 = vmatprep.subr.mxu0 %v1596_v41  ;;  %1489 = vmatprep.subr.bf16.mxu1 %v1488_v22 }
 0x651   :  { %1399 = vmatmul.mubr.msk.f32.vlgmr.msra.gmra.mrb[12].mxu0 %vm263_vm3, %v683_v43  ;;  %v1163_v43 = vld [vmem:[%s1886_s5 + $0x20] sm:$0xff] }
 0x652   :  { %1407 = vmatpush3.msra.mxu0 %v850_v44  ;;  %1408 = vmatprep.mubr.msk.f32.mxu0 %vm1597_vm2, %v1596_v41  ;;  %v1496_v44 = vpack.c.bf16 %v1164_v45, %v1163_v43 }
 0x655   :  { %1409 = vmatmul.mubr.msk.f32.vlgmr.msra.gmra.mrb[14].mxu0 %vm263_vm3, %v848_v46  ;;  %v1165_v46 = vld [vmem:[%s1886_s5 + $0x30] sm:$0xff] }
 0x656   :  { %v1500_v48 = vpack.c.bf16 %v1166_v47, %v1165_v46 }
 0x720   :  { %v588_v50 = vpop.f32.mrb[10].mxu0 }
 0x721   :  { %593 = vrot.lane.b32.xlu1 %v588_v50, %s1601_s12  ;;  %v1390_v51 = vpop.f32.mrb[11].mxu0  ;;  %v1168_v50 = vld [vmem:[%s1886_s5 + $0x48] sm:$0xff] }
 0x722   :  { %v1504_v51 = vpack.c.bf16 %v1168_v50, %v1167_v49 }
 0x724   :  { %v756_v41 = vpop.f32.mrb[12].mxu0 }
 0x725   :  { %v1400_v52 = vpop.f32.mrb[13].mxu0 }
 0x726   :  { %v1170_v52 = vld [vmem:[%s1886_s5 + $0x58] sm:$0xff] }
 0x728   :  { %v921_v53 = vpop.f32.mrb[14].mxu0 }
 0x729   :  { %926 = vrot.lane.b32.xlu1 %v921_v53, %s1601_s12  ;;  %v1410_v54 = vpop.f32.mrb[15].mxu0  ;;  %v1171_v53 = vld [vmem:[%s1886_s5 + $0x60] sm:$0xff] }
 0x793   :  { %v594_v55 = vpop.permute.xlu1 %593 }
 0x794   :  { %v596_v56 = vsel %vm263_vm3, %v1750_v16, %v594_v55  ;;  %v1480_v16 = vpack.c.bf16 %v1057_v15, %v1056_v14  ;;  %v1172_v55 = vld [vmem:[%s1886_s5 + $0x68] sm:$0xff] }
 0x795   :  { %1415 = vmatprep.mubr.msk.f32.mxu1 %vm181_vm1, %v596_v56  ;;  %v1512_v56 = vpack.c.bf16 %v1172_v55, %v1171_v53 }
 0x796   :  { %1481 = vmatprep.subr.bf16.mxu0 %v1480_v16 }
 0x797   :  { %1483 = vmatpush3.bf16.msra.mxu0 %v1480_v16 }
 0x798   :  { %1485 = vmatprep.subr.bf16.mxu0 %v1484_v19 }
 0x79b   :  { %v927_v57 = vpop.permute.xlu1 %926  ;;  %1487 = vmatpush3.bf16.msra.mxu0 %v1484_v19 }
 0x79c   :  { %v929_v58 = vsel %vm263_vm3, %v756_v41, %v927_v57  ;;  %v1169_v41 = vld [vmem:[%s1886_s5 + $0x50] sm:$0xff] }
 0x79d   :  { %1416 = vmatmul.mubr.msk.f32.vlgmr.msra.gmra.mrb[4].mxu1 %vm181_vm1, %v929_v58  ;;  %v1508_v54 = vpack.c.bf16 %v1170_v52, %v1169_v41  ;;  %v1173_v57 = vld [vmem:[%s1886_s5 + $0x70] sm:$0xff]  ;;  %v1174_v58 = vld [vmem:[%s1886_s5 + $0x78] sm:$0xff]  ;;  %s1294_s5 = sld [smem:[#allocation2 + $0x1]] }
 0x79e   :  { %1491 = vmatpush3.bf16.msra.mxu1 %v1488_v22 }
 0x79f   :  { %1493 = vmatprep.subr.bf16.mxu1 %v1492_v42 }
 0x7a2   :  { %1495 = vmatpush3.bf16.msra.mxu1 %v1492_v42 }
 0x7a3   :  { %1497 = vmatprep.subr.bf16.mxu1 %v1496_v44  ;;  %v1250_v18 = vstv %s1294_s5 }
 0x7a6   :  { %1499 = vmatpush3.bf16.msra.mxu1 %v1496_v44 }
 0x7a7   :  { %1501 = vmatprep.subr.bf16.mxu1 %v1500_v48 }
 0x7aa   :  { %1503 = vmatpush3.bf16.msra.mxu1 %v1500_v48 }
 0x7ab   :  { %1505 = vmatprep.subr.bf16.mxu1 %v1504_v51 }
 0x7ae   :  { %1507 = vmatpush3.bf16.msra.mxu1 %v1504_v51 }
 0x7af   :  { %1509 = vmatprep.subr.bf16.mxu1 %v1508_v54 }
 0x7b2   :  { %1511 = vmatpush3.bf16.msra.mxu1 %v1508_v54 }
 0x7b3   :  { %1513 = vmatprep.subr.bf16.mxu1 %v1512_v56 }
 0x7b6   :  { %1515 = vmatpush3.bf16.msra.mxu1 %v1512_v56 }
 0x870   :  { %v1417_v60 = vpop.f32.mrb[4].mxu1 }
 0x871   :  { %v1015_v61 = vmul.f32 %v1417_v60, %v1013_v59  ;;  %v1002_v62 = vpop.f32.mrb[5].mxu1 }
 0x872   :  { %v1014_v63 = vmul.f32 %v1013_v59, %v1002_v62  ;;  %v1516_v59 = vpack.c.bf16 %v1174_v58, %v1173_v57 }
 0x873   :  { %v1783_v2 = vadd.f32 %v1015_v61, %v1655_v1 }
 0x874   :  { %v1786_v3 = vadd.f32 %v1014_v63, %v1650_v0  ;;  %1517 = vmatprep.subr.bf16.mxu1 %v1516_v59 }
 0x875   :  { %v1021_v4 = vsel %vm58_vm0, %v1783_v2, 0.0  ;;  %1519 = vmatpush3.bf16.msra.mxu1 %v1516_v59 }
 0x876   :  { %1022 = vadd.xlane.f32.xlu1 %v1021_v4  ;;  %v1018_v5 = vsel %vm58_vm0, %v1786_v3, 0.0 }
 0x877   :  { %1019 = vadd.xlane.f32.xlu0 %v1018_v5 }
 0x903   :  { %v1023_v6 = vpop.xlane.xlu1 %1022 }
 0x904   :  { %v1025_v7 = vmul.f32 0.03125, %v1023_v6  ;;  %v1020_v8 = vpop.xlane.xlu0 %1019 }
 0x905   :  { %v1024_v9 = vmul.f32 0.03125, %v1020_v8 }
 0x906   :  { %v1027_v10 = vsub.f32 %v1783_v2, %v1025_v7 }
 0x907   :  { %v1026_v1 = vsub.f32 %v1786_v3, %v1024_v9 }
 0x908   :  { %v1029_v12 = vmul.f32 %v1027_v10, %v1027_v10 }
 0x909   :  { %v1028_v11 = vmul.f32 %v1026_v1, %v1026_v1 }
 0x90a   :  { %v1033_v13 = vsel %vm58_vm0, %v1029_v12, 0.0 }
 0x90b   :  { %v1030_v0 = vsel %vm58_vm0, %v1028_v11, 0.0 }
 0x90c   :  { %1031 = vadd.xlane.f32.xlu0 %v1030_v0 }
 0x910   :  { %1034 = vadd.xlane.f32.xlu0 %v1033_v13 }
 0x999   :  { %v1032_v23 = vpop.xlane.xlu0 %1031 }
 0x99a   :  { %v1036_v24 = vmul.f32 0.03125, %v1032_v23 }
 0x99c   :  { %v1038_v25 = vadd.f32 1e-05, %v1036_v24 }
 0x99d   :  { %v1035_v26 = vpop.xlane.xlu0 %1034 }
 0x99e   :  { %1549 = vrsqrt.f32 %v1038_v25  ;;  %v1037_v27 = vmul.f32 0.03125, %v1035_v26 }
 0x9a0   :  { %v1039_v28 = vadd.f32 1e-05, %v1037_v27 }
 0x9a2   :  { %1551 = vrsqrt.f32 %v1039_v28 }
 0x9a8   :  { %v1550_v29 = vpop.eup %1549 }
 0x9a9   :  { %v1042_v31 = vmul.f32 %v1550_v29, %v1026_v1 }
 0x9ab   :  { %v1048_v33 = vmul.f32 %v1295_v30, %v1042_v31 }
 0x9ac   :  { %v1552_v34 = vpop.eup %1551 }
 0x9ad   :  { %v1043_v35 = vmul.f32 %v1552_v34, %v1027_v10  ;;  %v1054_v36 = vadd.f32 %v1296_v32, %v1048_v33 }
 0x9af   :  { %v1049_v37 = vmul.f32 %v1295_v30, %v1043_v35  ;;  %1426 = vmatprep.mubr.msk.f32.mxu0 %vm58_vm0, %v1054_v36 }
 0x9b1   :  { %v1055_v38 = vadd.f32 %v1296_v32, %v1049_v37 }
 0x9b3   :  { %1427 = vmatmul.mubr.msk.f32.vlgmr.msra.gmra.mrb[16].mxu0 %vm58_vm0, %v1055_v38 }
 0xa86   :  { %v1428_v60 = vpop.f32.mrb[16].mxu0 }
 0xa87   :  { %v1144_v61 = vmul.f32 0.044715, %v1428_v60  ;;  %v1132_v62 = vpop.f32.mrb[17].mxu0  ;;  %v1142_v15 = vmul.f32 0.5, %v1428_v60 }
 0xa88   :  { %v1143_v63 = vmul.f32 0.044715, %v1132_v62  ;;  %v1141_v13 = vmul.f32 0.5, %v1132_v62 }
 0xa89   :  { %v1146_v4 = vmul.f32 %v1428_v60, %v1144_v61 }
 0xa8a   :  { %v1145_v5 = vmul.f32 %v1143_v63, %v1132_v62 }
 0xa8b   :  { %v1148_v6 = vmul.f32 %v1428_v60, %v1146_v4 }
 0xa8c   :  { %v1147_v7 = vmul.f32 %v1145_v5, %v1132_v62 }
 0xa8d   :  { %v1150_v8 = vadd.f32 %v1428_v60, %v1148_v6 }
 0xa8e   :  { %v1149_v9 = vadd.f32 %v1147_v7, %v1132_v62 }
 0xa8f   :  { %v1152_v10 = vmul.f32 0.7978846, %v1150_v8 }
 0xa90   :  { %v1151_v1 = vmul.f32 0.7978846, %v1149_v9 }
 0xa91   :  { %1553 = vtanh.f32 %v1152_v10 }
 0xa92   :  { %1555 = vtanh.f32 %v1151_v1 }
 0xa9b   :  { %v1554_v11 = vpop.eup %1553 }
 0xa9c   :  { %v1556_v0 = vpop.eup %1555  ;;  %v1156_v12 = vadd.f32 1.0, %v1554_v11 }
 0xa9d   :  { %v1155_v14 = vadd.f32 1.0, %v1556_v0 }
 0xa9e   :  { %v1158_v17 = vmul.f32 %v1156_v12, %v1142_v15 }
 0xa9f   :  { %v1157_v16 = vmul.f32 %v1155_v14, %v1141_v13 }
 0xaa1   :  { %1461 = vmatprep.mubr.f32.mxu1 %v1157_v16 }
 0xaa2   :  { %1462 = vmatmul.mubr.f32.vlgmr.msra.gmra.mrb[6].mxu1 %v1158_v17 }
 0xb75   :  { %v1463_v19 = vpop.f32.mrb[6].mxu1 }
 0xb76   :  { %v1252_v20 = vmul.f32 %v1463_v19, %v1250_v18  ;;  %v1241_v21 = vpop.f32.mrb[7].mxu1 }
 0xb77   :  { %v1251_v22 = vmul.f32 %v1250_v18, %v1241_v21 }
 0xb78   :  { %v1254_v23 = vadd.f32 %v1252_v20, %v1783_v2 }
 0xb79   :  { %v1253_v24 = vadd.f32 %v1251_v22, %v1786_v3 }
 0xb7a   :  { %1256 = vst.msk [vmem:[#allocation5 + $0x8] sm:$0xff] %vm58_vm0, %v1254_v23 }
 0xb7b   :  { %1255 = vst.msk [vmem:[#allocation5] sm:$0xff] %vm58_vm0, %v1253_v24 }
 0xb7c   :  { %1580 = shalt.err (!%p1577_p9)
}
 0xb7d   :  { %s1581_s8 = scalar_lea.hbm %s1888_s7, 256 }
 0xb7e   :  { %p1582_p10 = scmp.ne.s32.totalorder %s1888_s7, %s1581_s8  ;;  %p1585_p11 = scmp.lt.u32.totalorder %s1581_s8, %s1888_s7 }
 0xb80   :  { %p1587_p12 = pnand %p1585_p11, %p1582_p10 }
 0xb82   :  { %1590 = shalt.err (!%p1587_p12)
}
 0xb83   :  { %s1603_s11 = smov 128  }
 0xb84   :  { %1268 = dma.vmem_to_hbm [thread:$0]  %s1263_s29, 256, %s1888_s7, [#allocation3], %s1603_s11, %s1603_s11, %s1601_s12  }
 0xb85   :  { %1593 = dma.done.wait [#allocation3], 256  }
 0xb86   :  { %1594 = vsyncadd [#allocation3], 4294967040 }
 0xb87   :  { %1272 = vsyncpa [#allocation3], 1 }
 0xb88   :  { %1273 = vsyncpa [#allocation4], 1 }

</bundles_post_ra>
